<compile_context>
chip_gen: v5e
topology: v5e:2x2
jax: 0.10.0
libtpu: 0.0.40
codegen_flags: <defaults>
</compile_context>

<pallas_src>
import functools

import jax
import jax.numpy as jnp
from jax.experimental import pallas as pl
from jax.experimental.pallas import tpu as pltpu


def _logreg_kernel(x_ref, wu_ref, ws_ref, b_ref, o_ref, *, num_u):
    x = x_ref[...].astype(jnp.float32)                      # (TB, C)
    TB, C = x.shape

    lane = jax.lax.broadcasted_iota(jnp.int32, (TB, C), 1)

    # Order-preserving int32 key of the float values (IEEE-754 trick).
    bits = pltpu.bitcast(x, jnp.int32)
    okey = jnp.where(bits >= 0, bits, bits ^ jnp.int32(0x7FFFFFFF))

    # Pack a unique per-lane tie-break code into the low bits so one max reduce
    # yields exactly one winning lane per row.  Ordering can only be perturbed
    # between values within 2^L ulps of each other (and exact ties are
    # interchangeable), so the selected values match torch.sort's.
    L = max(1, (C - 1).bit_length())
    code = jnp.int32(C - 1) - lane
    keys = jnp.bitwise_or(jnp.bitwise_and(okey, jnp.int32(~((1 << L) - 1))), code)

    neg = jnp.int32(jnp.iinfo(jnp.int32).min)
    # The unseen lanes (first num_u) never take part in the seen-part top-k.
    keys = jnp.where(lane < num_u, neg, keys)

    # Per-lane linear coefficients: w_u on the unseen lanes, w_s[rank] on the
    # rank-th largest seen lane (filled in below), 0 elsewhere.
    wu = wu_ref[...].astype(jnp.float32)                    # (1, C); first num_u used
    coeff = jnp.where(lane < num_u, wu, 0.0)

    # TODO(synk): for large num_u / num_class a bitonic top-k (pltpu.roll +
    # compare-exchange stages) would replace this O(num_u) extraction loop.
    for k in range(num_u):
        max_key = jnp.max(keys, axis=-1, keepdims=True)     # 1 XLU reduce per rank
        hit = keys == max_key                               # exactly one lane per row
        coeff = jnp.where(hit, ws_ref[k], coeff)            # scalar weight from SMEM
        keys = jnp.where(hit, neg, keys)

    # Fused Linear(2*num_u -> 1): one VPU multiply + one lane reduce.
    r = jnp.sum(x * coeff, axis=-1, keepdims=True) + b_ref[0]
    o_ref[...] = r.astype(o_ref.dtype)


def _round_up(n, m):
    return (n + m - 1) // m * m


def logistic_regression_forward(x, weight, bias, *, num_u, block_rows=1024):
    """x: (B, num_class); weight: (1, 2*num_u) or (2*num_u,); bias: (1,). Returns (B,) f32."""
    B, C = x.shape
    if C - num_u < num_u:
        raise ValueError(
            "num_class - num_unseen must be >= num_unseen "
            "(Linear(2*num_u) needs num_unseen top values from the seen part).")

    w = jnp.asarray(weight, jnp.float32).reshape(2 * num_u)
    wu_row = jnp.zeros((1, C), jnp.float32).at[0, :num_u].set(w[:num_u])  # VMEM row
    ws = w[num_u:]                                                        # SMEM scalars
    b_smem = jnp.asarray(bias, jnp.float32).reshape(1)                    # SMEM scalar

    # Batch tile: sublane-aligned for x's dtype, sized against a conservative
    # VMEM budget (input tile is double-buffered) so it also fits v7x's VMEM.
    itemsize = jnp.dtype(x.dtype).itemsize
    sub = 8 * max(1, 4 // itemsize)               # 8 (f32) / 16 (bf16) / 32 (int8)
    lane_pad = _round_up(C, 128)
    vmem_budget = 4 * 1024 * 1024
    max_tb = max(sub, (vmem_budget // (2 * lane_pad * itemsize)) // sub * sub)
    tb = max(sub, min(_round_up(block_rows, sub), max_tb, _round_up(B, sub)))
    b_pad = _round_up(B, tb)
    if b_pad != B:
        x = jnp.pad(x, ((0, b_pad - B), (0, 0)))

    out = pl.pallas_call(
        functools.partial(_logreg_kernel, num_u=num_u),
        out_shape=jax.ShapeDtypeStruct((b_pad, 1), jnp.float32),
        grid=(b_pad // tb,),
        in_specs=[
            pl.BlockSpec((tb, C), lambda i: (i, 0)),
            pl.BlockSpec((1, C), lambda i: (0, 0)),
            pl.BlockSpec(memory_space=pltpu.MemorySpace.SMEM),
            pl.BlockSpec(memory_space=pltpu.MemorySpace.SMEM),
        ],
        out_specs=pl.BlockSpec((tb, 1), lambda i: (i, 0)),
        compiler_params=pltpu.CompilerParams(
            dimension_semantics=("parallel",)),
    )(x, wu_row, ws, b_smem)
    return out[:B, 0]


def _reference_forward(x, weight, bias, *, num_u):
    u = x[:, :num_u]
    s = -jnp.sort(-x[:, num_u:], axis=1)[:, :num_u]
    feat = jnp.concatenate([u, s], axis=-1)
    return feat @ jnp.asarray(weight, jnp.float32).reshape(2 * num_u) + bias[0]


if __name__ == "__main__":
    # Small shapes consistent with the module: num_class total scores per row,
    # num_unseen of them are the "unseen" scores.
    num_class = 12
    num_unseen = 4
    B = 8

    key = jax.random.PRNGKey(0)
    kx, kw = jax.random.split(key)

    x = jax.random.normal(kx, (B, num_class), dtype=jnp.float32)

    # weights_init: bias = 0, weight ~ xavier_uniform(gain=0.5) for Linear(2*num_u, 1).
    fan_in, fan_out = 2 * num_unseen, 1
    bound = 0.5 * (6.0 / (fan_in + fan_out)) ** 0.5
    weight = jax.random.uniform(kw, (1, 2 * num_unseen), jnp.float32,
                                minval=-bound, maxval=bound)
    bias = jnp.zeros((1,), jnp.float32)
    # TODO(synk): self.l2 and self.bn are defined in __init__ but unused in forward; omitted.

    r = logistic_regression_forward(x, weight, bias, num_u=num_unseen)
    jax.block_until_ready(r)

    r_ref = _reference_forward(x, weight, bias, num_u=num_unseen)
    assert r.shape == (B,)
    assert jnp.allclose(r, r_ref, atol=1e-5, rtol=1e-5), (r, r_ref)
    print("KERNEL_OK")
</pallas_src>

<mosaic_0001>
module attributes {stable_mosaic.version = 11 : i64} {
  func.func @_logreg_kernel(%arg0: i32, %arg1: memref<8x12xf32, #tpu.memory_space<vmem>>, %arg2: memref<1x12xf32, #tpu.memory_space<vmem>>, %arg3: memref<4xf32, #tpu.memory_space<smem>>, %arg4: memref<1xf32, #tpu.memory_space<smem>>, %arg5: memref<8x1xf32, #tpu.memory_space<vmem>>) attributes {dimension_semantics = [#tpu.dimension_semantics<parallel>], iteration_bounds = array<i64: 1>, scalar_prefetch = 0 : i64, scratch_operands = 0 : i64, tpu.core_type = #tpu.core_type<tc>, window_params = [{transform_indices = @transform_0, window_bounds = array<i64: 8, 12>}, {pipeline_mode = #tpu.pipeline_mode<synchronous>, transform_indices = @transform_1, window_bounds = array<i64: 1, 12>}, {transform_indices = @transform_2, window_bounds = array<i64: 4>}, {transform_indices = @transform_3, window_bounds = array<i64: 1>}, {transform_indices = @transform_4, window_bounds = array<i64: 8, 1>}]} {
    %c0 = arith.constant 0 : index
    %c0_0 = arith.constant 0 : index
    %0 = vector.load %arg1[%c0, %c0_0] : memref<8x12xf32, #tpu.memory_space<vmem>>, vector<8x12xf32>
    %1 = tpu.iota {dimensions = array<i32: 1>} : vector<8x12xi32>
    %2 = tpu.bitcast %0 : vector<8x12xf32> -> vector<8x12xi32>
    %c0_i32 = arith.constant 0 : i32
    %3 = vector.broadcast %c0_i32 : i32 to vector<8x12xi32>
    %4 = arith.cmpi sge, %2, %3 : vector<8x12xi32>
    %c2147483647_i32 = arith.constant 2147483647 : i32
    %5 = vector.broadcast %c2147483647_i32 : i32 to vector<8x12xi32>
    %6 = arith.xori %2, %5 : vector<8x12xi32>
    %7 = arith.select %4, %2, %6 : vector<8x12xi1>, vector<8x12xi32>
    %c11_i32 = arith.constant 11 : i32
    %8 = vector.broadcast %c11_i32 : i32 to vector<8x12xi32>
    %9 = arith.subi %8, %1 : vector<8x12xi32>
    %c-16_i32 = arith.constant -16 : i32
    %10 = vector.broadcast %c-16_i32 : i32 to vector<8x12xi32>
    %11 = arith.andi %7, %10 : vector<8x12xi32>
    %12 = arith.ori %11, %9 : vector<8x12xi32>
    %c4_i32 = arith.constant 4 : i32
    %13 = vector.broadcast %c4_i32 : i32 to vector<8x12xi32>
    %14 = arith.cmpi slt, %1, %13 : vector<8x12xi32>
    %c-2147483648_i32 = arith.constant -2147483648 : i32
    %15 = vector.broadcast %c-2147483648_i32 : i32 to vector<8x12xi32>
    %16 = arith.select %14, %15, %12 : vector<8x12xi1>, vector<8x12xi32>
    %c0_1 = arith.constant 0 : index
    %c0_2 = arith.constant 0 : index
    %17 = vector.load %arg2[%c0_1, %c0_2] : memref<1x12xf32, #tpu.memory_space<vmem>>, vector<1x12xf32>
    %c4_i32_3 = arith.constant 4 : i32
    %18 = vector.broadcast %c4_i32_3 : i32 to vector<8x12xi32>
    %19 = arith.cmpi slt, %1, %18 : vector<8x12xi32>
    %cst = arith.constant 0.000000e+00 : f32
    %20 = vector.shape_cast %17 : vector<1x12xf32> to vector<1x12xf32>
    %21 = vector.broadcast %20 : vector<1x12xf32> to vector<8x12xf32>
    %22 = vector.broadcast %cst : f32 to vector<8x12xf32>
    %23 = arith.select %19, %21, %22 : vector<8x12xi1>, vector<8x12xf32>
    %cst_4 = arith.constant dense<-2147483648> : vector<8xi32>
    %24 = vector.multi_reduction <maxsi>, %16, %cst_4 [1] : vector<8x12xi32> to vector<8xi32>
    %25 = vector.shape_cast %24 : vector<8xi32> to vector<8x1xi32>
    %26 = vector.broadcast %25 : vector<8x1xi32> to vector<8x12xi32>
    %27 = arith.cmpi eq, %16, %26 : vector<8x12xi32>
    %c0_5 = arith.constant 0 : index
    %28 = memref.load %arg3[%c0_5] : memref<4xf32, #tpu.memory_space<smem>>
    %29 = vector.broadcast %28 : f32 to vector<8x12xf32>
    %30 = arith.select %27, %29, %23 : vector<8x12xi1>, vector<8x12xf32>
    %c-2147483648_i32_6 = arith.constant -2147483648 : i32
    %31 = vector.broadcast %c-2147483648_i32_6 : i32 to vector<8x12xi32>
    %32 = arith.select %27, %31, %16 : vector<8x12xi1>, vector<8x12xi32>
    %cst_7 = arith.constant dense<-2147483648> : vector<8xi32>
    %33 = vector.multi_reduction <maxsi>, %32, %cst_7 [1] : vector<8x12xi32> to vector<8xi32>
    %34 = vector.shape_cast %33 : vector<8xi32> to vector<8x1xi32>
    %35 = vector.broadcast %34 : vector<8x1xi32> to vector<8x12xi32>
    %36 = arith.cmpi eq, %32, %35 : vector<8x12xi32>
    %c1 = arith.constant 1 : index
    %37 = memref.load %arg3[%c1] : memref<4xf32, #tpu.memory_space<smem>>
    %38 = vector.broadcast %37 : f32 to vector<8x12xf32>
    %39 = arith.select %36, %38, %30 : vector<8x12xi1>, vector<8x12xf32>
    %c-2147483648_i32_8 = arith.constant -2147483648 : i32
    %40 = vector.broadcast %c-2147483648_i32_8 : i32 to vector<8x12xi32>
    %41 = arith.select %36, %40, %32 : vector<8x12xi1>, vector<8x12xi32>
    %cst_9 = arith.constant dense<-2147483648> : vector<8xi32>
    %42 = vector.multi_reduction <maxsi>, %41, %cst_9 [1] : vector<8x12xi32> to vector<8xi32>
    %43 = vector.shape_cast %42 : vector<8xi32> to vector<8x1xi32>
    %44 = vector.broadcast %43 : vector<8x1xi32> to vector<8x12xi32>
    %45 = arith.cmpi eq, %41, %44 : vector<8x12xi32>
    %c2 = arith.constant 2 : index
    %46 = memref.load %arg3[%c2] : memref<4xf32, #tpu.memory_space<smem>>
    %47 = vector.broadcast %46 : f32 to vector<8x12xf32>
    %48 = arith.select %45, %47, %39 : vector<8x12xi1>, vector<8x12xf32>
    %c-2147483648_i32_10 = arith.constant -2147483648 : i32
    %49 = vector.broadcast %c-2147483648_i32_10 : i32 to vector<8x12xi32>
    %50 = arith.select %45, %49, %41 : vector<8x12xi1>, vector<8x12xi32>
    %cst_11 = arith.constant dense<-2147483648> : vector<8xi32>
    %51 = vector.multi_reduction <maxsi>, %50, %cst_11 [1] : vector<8x12xi32> to vector<8xi32>
    %52 = vector.shape_cast %51 : vector<8xi32> to vector<8x1xi32>
    %53 = vector.broadcast %52 : vector<8x1xi32> to vector<8x12xi32>
    %54 = arith.cmpi eq, %50, %53 : vector<8x12xi32>
    %c3 = arith.constant 3 : index
    %55 = memref.load %arg3[%c3] : memref<4xf32, #tpu.memory_space<smem>>
    %56 = vector.broadcast %55 : f32 to vector<8x12xf32>
    %57 = arith.select %54, %56, %48 : vector<8x12xi1>, vector<8x12xf32>
    %58 = arith.mulf %0, %57 : vector<8x12xf32>
    %cst_12 = arith.constant dense<0.000000e+00> : vector<8xf32>
    %59 = vector.multi_reduction <add>, %58, %cst_12 [1] : vector<8x12xf32> to vector<8xf32>
    %60 = vector.shape_cast %59 : vector<8xf32> to vector<8x1xf32>
    %c0_13 = arith.constant 0 : index
    %61 = memref.load %arg4[%c0_13] : memref<1xf32, #tpu.memory_space<smem>>
    %62 = vector.broadcast %61 : f32 to vector<8x1xf32>
    %63 = arith.addf %60, %62 : vector<8x1xf32>
    %c0_14 = arith.constant 0 : index
    %c0_15 = arith.constant 0 : index
    %64 = vector.load %arg5[%c0_14, %c0_15] : memref<8x1xf32, #tpu.memory_space<vmem>>, vector<8x1xf32>
    tpu.vector_store %arg5[%c0_14, %c0_15], %63 {strides = array<i32>} : memref<8x1xf32, #tpu.memory_space<vmem>>, vector<8x1xf32>,
    return
  }
  func.func @transform_0(%arg0: i32) -> (i32, i32) {
    %c0_i32 = arith.constant 0 : i32
    %c0_i32_0 = arith.constant 0 : i32
    return %arg0, %c0_i32 : i32, i32
  }
  func.func @transform_1(%arg0: i32) -> (i32, i32) {
    %c0_i32 = arith.constant 0 : i32
    %c0_i32_0 = arith.constant 0 : i32
    %c0_i32_1 = arith.constant 0 : i32
    return %c0_i32, %c0_i32_0 : i32, i32
  }
  func.func @transform_2(%arg0: i32) -> i32 {
    %c0_i32 = arith.constant 0 : i32
    %c0_i32_0 = arith.constant 0 : i32
    return %c0_i32 : i32
  }
  func.func @transform_3(%arg0: i32) -> i32 {
    %c0_i32 = arith.constant 0 : i32
    %c0_i32_0 = arith.constant 0 : i32
    return %c0_i32 : i32
  }
  func.func @transform_4(%arg0: i32) -> (i32, i32) {
    %c0_i32 = arith.constant 0 : i32
    %c0_i32_0 = arith.constant 0 : i32
    return %arg0, %c0_i32 : i32, i32
  }
}

</mosaic_0001>

<bundles_post_ra>
// kernel: tpu_custom_call.1
= control target key start
LH: loop header
LB: loop body
LE: loop exit
PB: predicated region body
PF: predicated region fallthrough
CT: control target
= control target key end

     0   :  { %10 = vsyncpa [#allocation4], 0  ;;  %s258_s0 = inlined_call_operand.hbm [shape: f32[8,12], index: 0, kind: input, shape index: {}]   ;;  %s259_s1 = inlined_call_operand.vmem [shape: f32[1,12], index: 1, kind: input, shape index: {}]   ;;  %s260_s2 = inlined_call_operand.vmem [shape: f32[4], index: 2, kind: input, shape index: {}]   ;;  %s261_s3 = inlined_call_operand.<no memory space> [shape: f32[1], index: 3, kind: input, shape index: {}]   ;;  %s262_s4 = inlined_call_operand.vmem [shape: f32[8,1], index: 4, kind: output, shape index: {}]  }
   0x1   :  { %s17_s17 = sshll.u32 %s258_s0, 4  ;;  %s18_s17 = int_to_ptr.hbm [resolvable:$true] %s17_s17 }
   0x2   :  { %11 = vsyncpa [#allocation5], 0  ;;  %s203_s18 = smov [#allocation3]   ;;  %s30_s22 = sshll.u32 %s260_s2, 4  ;;  %s31_s22 = int_to_ptr.vmem [resolvable:$true] %s30_s22 }
   0x3   :  { %s19_s19 = sshll.u32 %s203_s18, 4  ;;  %s204_s23 = smov [#allocation6]   ;;  %s20_s19 = int_to_ptr.vmem [resolvable:$true] %s19_s19 }
   0x4   :  { %22 = dma.hbm_to_vmem [thread:$0]  %s18_s17, 128, %s20_s19, [#allocation4]  }
   0x5   :  { %33 = dma.vmem_to_smem %s31_s22, 16, %s204_s23, [#allocation5]  }
   0x6   :  { %199 = dma.done.wait [#allocation4], 128  }
   0x7   :  { %200 = vsyncadd [#allocation4], 4294967168 }
   0x8   :  { %201 = dma.done.wait [#allocation5], 16  }
   0x9   :  { %202 = vsyncadd [#allocation5], 4294967280 }
   0xa   :  { %44 = sfence }
   0xb   :  { %v236_v0 = vld [vmem:[#allocation3] sm:$0xff]  ;;  %v46_v1 = vlaneseq  ;;  %vm62_vm2 = vcmask 97280   ;;  %s79_s0 = sld [smem:[#allocation6]]  ;;  %vm149_vm11 = vcmask 7168  }
   0xc   :  { %vm49_vm0 = vcmp.ge.s32.totalorder %v236_v0, 0  ;;  %v50_v2 = vxor.u32 2147483647, %v236_v0  ;;  %v162_v17 = vld [vmem:[%s259_s1] ss:$0 sm:$0xff]  ;;  %s157_s1 = sld [smem:[#allocation6 + $0x1]] }
   0xd   :  { %v47_v3 = vand.u32 127, %v46_v1  ;;  %s158_s25 = sld [smem:[#allocation6 + $0x2]] }
   0xe   :  { %v51_v4 = vsel %vm49_vm0, %v236_v0, %v50_v2  ;;  %s159_s26 = sld [smem:[#allocation6 + $0x3]] }
   0xf   :  { %v52_v5 = vsub.s32 11, %v47_v3  ;;  %v53_v6 = vand.u32 4294967280, %v51_v4  ;;  %vm55_vm1 = vcmp.lt.s32.totalorder %v47_v3, 4 }
  0x10   :  { %v61_v21 = vsel %vm55_vm1, %v162_v17, 0.0 }
  0x11   :  { %v54_v7 = vor.u32 %v53_v6, %v52_v5  ;;  %v80_v22 = vstv %s79_s0 }
  0x12   :  { %v100_v37 = vstv %s157_s1 }
  0x13   :  { %v56_v8 = vsel %vm55_vm1, 2147483648, %v54_v7  ;;  %v120_v53 = vstv %s158_s25 }
  0x14   :  { %v63_v9 = vsel %vm62_vm2, %v56_v8, 2147483648  ;;  %v140_v5 = vstv %s159_s26 }
  0x15   :  { %v65_v10 = vshra.s32 %v63_v9, 16  ;;  %v64_v12 = vand.u32 65535, %v63_v9  ;;  %v147_v9 = vstv %s261_s3 }
  0x17   :  { %v67_v11 = vcvt.s32.f32 %v65_v10  ;;  %v66_v13 = vcvt.s32.f32 %v64_v12 }
  0x19   :  { %68 = vmax.xlane.f32.xlu0 %v67_v11 }
  0x8c   :  { %v69_v14 = vpop.xlane.xlu0 %68 }
  0x8d   :  { %vm70_vm3 = vcmp.eq.f32.partialorder %v67_v11, %v69_v14  ;;  %v75_v16 = vcvt.f32.s32 %v69_v14 }
  0x8e   :  { %v71_v15 = vsel %vm70_vm3, %v66_v13, -inf }
  0x8f   :  { %72 = vmax.xlane.f32.xlu0 %v71_v15  ;;  %v76_v19 = vshll.u32 %v75_v16, 16 }
 0x102   :  { %v73_v18 = vpop.xlane.xlu0 %72 }
 0x103   :  { %v74_v20 = vcvt.f32.s32 %v73_v18 }
 0x105   :  { %v77_v23 = vadd.s32 %v76_v19, %v74_v20 }
 0x107   :  { %vm78_vm4 = vcmp.eq.s32.totalorder %v56_v8, %v77_v23 }
 0x108   :  { %v81_v24 = vsel %vm78_vm4, %v80_v22, %v61_v21  ;;  %v82_v25 = vsel %vm78_vm4, 2147483648, %v56_v8 }
 0x109   :  { %v83_v26 = vsel %vm62_vm2, %v82_v25, 2147483648 }
 0x10a   :  { %v85_v27 = vshra.s32 %v83_v26, 16  ;;  %v84_v29 = vand.u32 65535, %v83_v26 }
 0x10c   :  { %v87_v28 = vcvt.s32.f32 %v85_v27  ;;  %v86_v31 = vcvt.s32.f32 %v84_v29 }
 0x10e   :  { %88 = vmax.xlane.f32.xlu1 %v87_v28 }
 0x181   :  { %v89_v30 = vpop.xlane.xlu1 %88 }
 0x182   :  { %vm90_vm5 = vcmp.eq.f32.partialorder %v87_v28, %v89_v30  ;;  %v95_v33 = vcvt.f32.s32 %v89_v30 }
 0x183   :  { %v91_v32 = vsel %vm90_vm5, %v86_v31, -inf }
 0x184   :  { %92 = vmax.xlane.f32.xlu1 %v91_v32  ;;  %v96_v35 = vshll.u32 %v95_v33, 16 }
 0x1f7   :  { %v93_v34 = vpop.xlane.xlu1 %92 }
 0x1f8   :  { %v94_v36 = vcvt.f32.s32 %v93_v34 }
 0x1fa   :  { %v97_v38 = vadd.s32 %v96_v35, %v94_v36 }
 0x1fc   :  { %vm98_vm6 = vcmp.eq.s32.totalorder %v82_v25, %v97_v38 }
 0x1fd   :  { %v101_v39 = vsel %vm98_vm6, %v100_v37, %v81_v24  ;;  %v102_v40 = vsel %vm98_vm6, 2147483648, %v82_v25 }
 0x1fe   :  { %v103_v41 = vsel %vm62_vm2, %v102_v40, 2147483648 }
 0x1ff   :  { %v105_v42 = vshra.s32 %v103_v41, 16  ;;  %v104_v44 = vand.u32 65535, %v103_v41 }
 0x201   :  { %v107_v43 = vcvt.s32.f32 %v105_v42  ;;  %v106_v46 = vcvt.s32.f32 %v104_v44 }
 0x203   :  { %108 = vmax.xlane.f32.xlu2 %v107_v43 }
 0x276   :  { %v109_v45 = vpop.xlane.xlu2 %108 }
 0x277   :  { %vm110_vm7 = vcmp.eq.f32.partialorder %v107_v43, %v109_v45  ;;  %v115_v48 = vcvt.f32.s32 %v109_v45 }
 0x278   :  { %v111_v47 = vsel %vm110_vm7, %v106_v46, -inf }
 0x279   :  { %112 = vmax.xlane.f32.xlu2 %v111_v47  ;;  %v116_v50 = vshll.u32 %v115_v48, 16 }
 0x2ec   :  { %v113_v49 = vpop.xlane.xlu2 %112 }
 0x2ed   :  { %v114_v51 = vcvt.f32.s32 %v113_v49 }
 0x2ef   :  { %v117_v52 = vadd.s32 %v116_v50, %v114_v51 }
 0x2f1   :  { %vm118_vm8 = vcmp.eq.s32.totalorder %v102_v40, %v117_v52 }
 0x2f2   :  { %v122_v54 = vsel %vm118_vm8, 2147483648, %v102_v40  ;;  %v121_v55 = vsel %vm118_vm8, %v120_v53, %v101_v39 }
 0x2f3   :  { %v123_v56 = vsel %vm62_vm2, %v122_v54, 2147483648 }
 0x2f4   :  { %v125_v57 = vshra.s32 %v123_v56, 16  ;;  %v124_v59 = vand.u32 65535, %v123_v56 }
 0x2f6   :  { %v127_v58 = vcvt.s32.f32 %v125_v57  ;;  %v126_v61 = vcvt.s32.f32 %v124_v59 }
 0x2f8   :  { %128 = vmax.xlane.f32.xlu0 %v127_v58 }
 0x36b   :  { %v129_v60 = vpop.xlane.xlu0 %128 }
 0x36c   :  { %vm130_vm9 = vcmp.eq.f32.partialorder %v127_v58, %v129_v60  ;;  %v135_v63 = vcvt.f32.s32 %v129_v60 }
 0x36d   :  { %v131_v62 = vsel %vm130_vm9, %v126_v61, -inf }
 0x36e   :  { %132 = vmax.xlane.f32.xlu1 %v131_v62  ;;  %v136_v2 = vshll.u32 %v135_v63, 16 }
 0x3e1   :  { %v133_v1 = vpop.xlane.xlu1 %132 }
 0x3e2   :  { %v134_v3 = vcvt.f32.s32 %v133_v1 }
 0x3e4   :  { %v137_v4 = vadd.s32 %v136_v2, %v134_v3 }
 0x3e6   :  { %vm138_vm10 = vcmp.eq.s32.totalorder %v122_v54, %v137_v4 }
 0x3e7   :  { %v141_v6 = vsel %vm138_vm10, %v140_v5, %v121_v55 }
 0x3e8   :  { %v142_v7 = vmul.f32 %v141_v6, %v236_v0 }
 0x3ea   :  { %v143_v8 = vsel %vm62_vm2, %v142_v7, 0.0 }
 0x3eb   :  { %144 = vadd.xlane.f32.xlu2 %v143_v8 }
 0x45e   :  { %v145_v10 = vpop.xlane.xlu2 %144 }
 0x45f   :  { %v148_v11 = vadd.f32 %v147_v9, %v145_v10 }
 0x461   :  { %150 = vst.msk [vmem:[%s262_s4] sm:$0xff] %vm149_vm11, %v148_v11 }
 0x462   :  { %155 = vsyncpa [#allocation4], 1 }
 0x463   :  { %156 = vsyncpa [#allocation5], 1 }

</bundles_post_ra>
